<compile_context>
chip_gen: v7x
topology: tpu7x:2x2x1
jax: 0.10.0
libtpu: 0.0.40
codegen_flags: <defaults>
</compile_context>

<pallas_src>
import functools
import math

import jax
import jax.numpy as jnp
from jax.experimental import pallas as pl
from jax.experimental.pallas import tpu as pltpu


def _round_up(x, m):
    return ((x + m - 1) // m) * m


def _pick_hw_tile(hw, max_tile):
    """Pick a spatial tile size (multiple of 128), preferring exact divisors."""
    max_tile = max(128, (max_tile // 128) * 128)
    if hw <= max_tile:
        return _round_up(hw, 128)
    for t in range(max_tile, 127, -128):   # prefer no-padding tilings
        if hw % t == 0:
            return t
    return max_tile                         # will require zero padding + mask


def _tree_reduce(vals, op):
    """Pairwise (log-depth) reduce of a Python list of arrays."""
    while len(vals) > 1:
        nxt = [op(vals[i], vals[i + 1]) for i in range(0, len(vals) - 1, 2)]
        if len(vals) % 2:
            nxt.append(vals[-1])
        vals = nxt
    return vals[0]


def channel_attention_kernel(x_ref, w1_ref, b1_ref, w2_ref, b2_ref, o_ref,
                             sum_acc, max_acc, *, hw_total, hw_tile, needs_mask):
    # Grid = (B, num_hw_tiles); axis 1 is the spatial reduction axis (last).
    k = pl.program_id(1)

    @pl.when(k == 0)
    def _init():
        sum_acc[...] = jnp.zeros(sum_acc.shape, sum_acc.dtype)
        max_acc[...] = jnp.full(max_acc.shape, -jnp.inf, max_acc.dtype)

    x = x_ref[0].astype(jnp.float32)                 # (C, hw_tile), f32 accum

    if needs_mask:
        # Host padded the tail with zeros: exact for the sum, mask only the max.
        lane = jax.lax.broadcasted_iota(jnp.int32, x.shape, 1)
        valid = (k * hw_tile + lane) < hw_total
        xm = jnp.where(valid, x, -jnp.inf)
    else:
        xm = x

    # VPU-only accumulation: fold 128-lane chunks into (C, 128) accumulators
    # with a log-depth tree.  The cross-lane (XLU) reduce happens only once,
    # in the finalize branch below.
    n_chunks = hw_tile // 128
    s_chunks = [x[:, j * 128:(j + 1) * 128] for j in range(n_chunks)]
    m_chunks = [xm[:, j * 128:(j + 1) * 128] for j in range(n_chunks)]
    sum_acc[...] = sum_acc[...] + _tree_reduce(s_chunks, jnp.add)
    max_acc[...] = jnp.maximum(max_acc[...], _tree_reduce(m_chunks, jnp.maximum))

    @pl.when(k == pl.num_programs(1) - 1)
    def _finalize():
        # Single XLU lane-reduce per accumulator, then the tiny fc stack.
        avg_col = jnp.sum(sum_acc[...], axis=-1, keepdims=True) * (1.0 / hw_total)
        max_col = jnp.max(max_acc[...], axis=-1, keepdims=True)
        s_col = avg_col + max_col                                      # (C, 1)

        # PyTorch Linear (out, in) weights applied to a column vector.
        h = jnp.dot(w1_ref[...], s_col,
                    preferred_element_type=jnp.float32) + b1_ref[...]  # (Ch, 1)
        h = jnp.maximum(h, 0.0)                                        # ReLU
        logits = jnp.dot(w2_ref[...], h,
                         preferred_element_type=jnp.float32) + b2_ref[...]  # (C, 1)
        o_ref[0] = jax.nn.sigmoid(logits).astype(o_ref.dtype)


def channel_attention(x, w1, b1, w2, b2, *, hw_tile_max=2048):
    """ChannelAttention forward.

    x:  (B, C, H, W)
    w1: (C//r, C)  first Linear weight, PyTorch (out, in) layout
    b1: (C//r,)
    w2: (C, C//r)  second Linear weight, PyTorch (out, in) layout
    b2: (C,)
    returns (B, C, 1, 1) channel-attention weights.
    """
    B, C, H, W = x.shape
    Ch = w1.shape[0]
    HW = H * W

    hw_tile = _pick_hw_tile(HW, hw_tile_max)
    hw_padded = _round_up(HW, hw_tile)
    num_k = hw_padded // hw_tile
    needs_mask = hw_padded != HW

    x_flat = x.reshape(B, C, HW)
    if needs_mask:
        x_flat = jnp.pad(x_flat, ((0, 0), (0, 0), (0, hw_padded - HW)))

    b1_col = b1.reshape(Ch, 1)
    b2_col = b2.reshape(C, 1)

    kernel = functools.partial(
        channel_attention_kernel,
        hw_total=HW, hw_tile=hw_tile, needs_mask=needs_mask)

    # VMEM budget: double-buffered x tile + weights + accumulators, headroom.
    x_block_bytes = C * hw_tile * x.dtype.itemsize
    vmem_limit_bytes = int(min(64 * 1024 * 1024,
                               max(32 * 1024 * 1024, 4 * x_block_bytes)))

    out = pl.pallas_call(
        kernel,
        out_shape=jax.ShapeDtypeStruct((B, C, 1), x.dtype),
        grid_spec=pltpu.PrefetchScalarGridSpec(
            num_scalar_prefetch=0,
            grid=(B, num_k),                      # reduction axis last
            in_specs=[
                pl.BlockSpec((1, C, hw_tile), lambda b, k: (b, 0, k)),
                pl.BlockSpec((Ch, C), lambda b, k: (0, 0)),
                pl.BlockSpec((Ch, 1), lambda b, k: (0, 0)),
                pl.BlockSpec((C, Ch), lambda b, k: (0, 0)),
                pl.BlockSpec((C, 1), lambda b, k: (0, 0)),
            ],
            out_specs=pl.BlockSpec((1, C, 1), lambda b, k: (b, 0, 0)),
            scratch_shapes=[
                pltpu.VMEM((C, 128), jnp.float32),   # running sum
                pltpu.VMEM((C, 128), jnp.float32),   # running max
            ],
        ),
        compiler_params=pltpu.CompilerParams(
            dimension_semantics=("parallel", "arbitrary"),
            vmem_limit_bytes=vmem_limit_bytes,
        ),
    )(x_flat, w1, b1_col, w2, b2_col)

    # .view(B, C, 1, 1) in the PyTorch module
    return out.reshape(B, C, 1, 1)


def _init_linear(key, out_features, in_features, dtype=jnp.float32):
    # Deterministic PyTorch-style init: U(-1/sqrt(fan_in), 1/sqrt(fan_in)).
    # Weight kept in PyTorch (out, in) layout.
    kw, kb = jax.random.split(key)
    bound = 1.0 / math.sqrt(in_features)
    w = jax.random.uniform(kw, (out_features, in_features), dtype,
                           minval=-bound, maxval=bound)
    b = jax.random.uniform(kb, (out_features,), dtype,
                           minval=-bound, maxval=bound)
    return w, b


def _ref_channel_attention(x, w1, b1, w2, b2):
    avg_ref = jnp.mean(x, axis=(2, 3))
    max_ref = jnp.max(x, axis=(2, 3))
    s_ref = avg_ref + max_ref
    h_ref = jnp.maximum(s_ref @ w1.T + b1, 0.0)
    B, C = s_ref.shape
    return jax.nn.sigmoid(h_ref @ w2.T + b2).reshape(B, C, 1, 1)


if __name__ == "__main__":
    # reduction_ratio=16 => need C >= 16; use C=32 so hidden=2.
    B, C, H, W = 2, 32, 16, 16
    reduction_ratio = 16
    Ch = C // reduction_ratio

    key = jax.random.PRNGKey(0)
    kx, k1, k2 = jax.random.split(key, 3)

    x = jax.random.normal(kx, (B, C, H, W), jnp.float32)
    w1, b1 = _init_linear(k1, Ch, C)   # Linear(C -> Ch), weight (Ch, C)
    w2, b2 = _init_linear(k2, C, Ch)   # Linear(Ch -> C), weight (C, Ch)

    # Exercise: multi-step reduction (HW=256 as 2x128 tiles), single-step
    # (whole HW in one tile), and the padded/masked tail path (HW=100 -> 128).
    out_multi = channel_attention(x, w1, b1, w2, b2, hw_tile_max=128)
    out_single = channel_attention(x, w1, b1, w2, b2)
    x_odd = jax.random.normal(kx, (B, C, 10, 10), jnp.float32)
    out_masked = channel_attention(x_odd, w1, b1, w2, b2)
    out_multi, out_single, out_masked = jax.block_until_ready(
        (out_multi, out_single, out_masked))

    # Pure-JAX references.
    ref = _ref_channel_attention(x, w1, b1, w2, b2)
    ref_odd = _ref_channel_attention(x_odd, w1, b1, w2, b2)

    assert out_multi.shape == (B, C, 1, 1)
    assert jnp.allclose(out_multi, ref, atol=1e-5, rtol=1e-5)
    assert jnp.allclose(out_single, ref, atol=1e-5, rtol=1e-5)
    assert jnp.allclose(out_masked, ref_odd, atol=1e-5, rtol=1e-5)

    print("KERNEL_OK")
</pallas_src>

<mosaic_0001>
module attributes {stable_mosaic.version = 11 : i64} {
  func.func @channel_attention_kernel(%arg0: i32, %arg1: i32, %arg2: memref<1x32x128xf32, #tpu.memory_space<vmem>>, %arg3: memref<2x32xf32, #tpu.memory_space<vmem>>, %arg4: memref<2x1xf32, #tpu.memory_space<vmem>>, %arg5: memref<32x2xf32, #tpu.memory_space<vmem>>, %arg6: memref<32x1xf32, #tpu.memory_space<vmem>>, %arg7: memref<1x32x1xf32, #tpu.memory_space<vmem>>, %arg8: memref<32x128xf32, #tpu.memory_space<vmem>>, %arg9: memref<32x128xf32, #tpu.memory_space<vmem>>) attributes {dimension_semantics = [#tpu.dimension_semantics<parallel>, #tpu.dimension_semantics<arbitrary>], iteration_bounds = array<i64: 2, 2>, scalar_prefetch = 0 : i64, scratch_operands = 2 : i64, tpu.core_type = #tpu.core_type<tc>, window_params = [{transform_indices = @transform_0, window_bounds = array<i64: 1, 32, 128>}, {pipeline_mode = #tpu.pipeline_mode<synchronous>, transform_indices = @transform_1, window_bounds = array<i64: 2, 32>}, {pipeline_mode = #tpu.pipeline_mode<synchronous>, transform_indices = @transform_2, window_bounds = array<i64: 2, 1>}, {pipeline_mode = #tpu.pipeline_mode<synchronous>, transform_indices = @transform_3, window_bounds = array<i64: 32, 2>}, {pipeline_mode = #tpu.pipeline_mode<synchronous>, transform_indices = @transform_4, window_bounds = array<i64: 32, 1>}, {transform_indices = @transform_5, window_bounds = array<i64: 1, 32, 1>}]} {
    %c0_i32 = arith.constant 0 : i32
    %0 = arith.cmpi eq, %arg1, %c0_i32 : i32
    %1 = arith.extui %0 : i1 to i32
    %c0_i32_0 = arith.constant 0 : i32
    %2 = arith.cmpi ne, %1, %c0_i32_0 : i32
    scf.if %2 {
      %cst = arith.constant 0.000000e+00 : f32
      %14 = vector.broadcast %cst : f32 to vector<32x128xf32>
      %c0_12 = arith.constant 0 : index
      %c0_13 = arith.constant 0 : index
      %15 = vector.load %arg8[%c0_12, %c0_13] : memref<32x128xf32, #tpu.memory_space<vmem>>, vector<32x128xf32>
      tpu.vector_store %arg8[%c0_12, %c0_13], %14 {strides = array<i32>} : memref<32x128xf32, #tpu.memory_space<vmem>>, vector<32x128xf32>,
      %cst_14 = arith.constant 0xFF800000 : f32
      %16 = vector.broadcast %cst_14 : f32 to vector<32x128xf32>
      %c0_15 = arith.constant 0 : index
      %c0_16 = arith.constant 0 : index
      %17 = vector.load %arg9[%c0_15, %c0_16] : memref<32x128xf32, #tpu.memory_space<vmem>>, vector<32x128xf32>
      tpu.vector_store %arg9[%c0_15, %c0_16], %16 {strides = array<i32>} : memref<32x128xf32, #tpu.memory_space<vmem>>, vector<32x128xf32>,
    } else {
    }
    %c0 = arith.constant 0 : index
    %c0_1 = arith.constant 0 : index
    %c0_2 = arith.constant 0 : index
    %3 = vector.load %arg2[%c0, %c0_1, %c0_2] : memref<1x32x128xf32, #tpu.memory_space<vmem>>, vector<1x32x128xf32>
    %4 = vector.shape_cast %3 : vector<1x32x128xf32> to vector<32x128xf32>
    %c0_3 = arith.constant 0 : index
    %c0_4 = arith.constant 0 : index
    %5 = vector.load %arg8[%c0_3, %c0_4] : memref<32x128xf32, #tpu.memory_space<vmem>>, vector<32x128xf32>
    %6 = arith.addf %5, %4 : vector<32x128xf32>
    %c0_5 = arith.constant 0 : index
    %c0_6 = arith.constant 0 : index
    %7 = vector.load %arg8[%c0_5, %c0_6] : memref<32x128xf32, #tpu.memory_space<vmem>>, vector<32x128xf32>
    tpu.vector_store %arg8[%c0_5, %c0_6], %6 {strides = array<i32>} : memref<32x128xf32, #tpu.memory_space<vmem>>, vector<32x128xf32>,
    %c0_7 = arith.constant 0 : index
    %c0_8 = arith.constant 0 : index
    %8 = vector.load %arg9[%c0_7, %c0_8] : memref<32x128xf32, #tpu.memory_space<vmem>>, vector<32x128xf32>
    %9 = arith.maximumf %8, %4 : vector<32x128xf32>
    %c0_9 = arith.constant 0 : index
    %c0_10 = arith.constant 0 : index
    %10 = vector.load %arg9[%c0_9, %c0_10] : memref<32x128xf32, #tpu.memory_space<vmem>>, vector<32x128xf32>
    tpu.vector_store %arg9[%c0_9, %c0_10], %9 {strides = array<i32>} : memref<32x128xf32, #tpu.memory_space<vmem>>, vector<32x128xf32>,
    %c1_i32 = arith.constant 1 : i32
    %11 = arith.cmpi eq, %arg1, %c1_i32 : i32
    %12 = arith.extui %11 : i1 to i32
    %c0_i32_11 = arith.constant 0 : i32
    %13 = arith.cmpi ne, %12, %c0_i32_11 : i32
    scf.if %13 {
      %c0_12 = arith.constant 0 : index
      %c0_13 = arith.constant 0 : index
      %14 = vector.load %arg8[%c0_12, %c0_13] : memref<32x128xf32, #tpu.memory_space<vmem>>, vector<32x128xf32>
      %cst = arith.constant dense<0.000000e+00> : vector<32xf32>
      %15 = vector.multi_reduction <add>, %14, %cst [1] : vector<32x128xf32> to vector<32xf32>
      %16 = vector.shape_cast %15 : vector<32xf32> to vector<32x1xf32>
      %cst_14 = arith.constant 3.906250e-03 : f32
      %17 = vector.broadcast %cst_14 : f32 to vector<32x1xf32>
      %18 = arith.mulf %16, %17 : vector<32x1xf32>
      %c0_15 = arith.constant 0 : index
      %c0_16 = arith.constant 0 : index
      %19 = vector.load %arg9[%c0_15, %c0_16] : memref<32x128xf32, #tpu.memory_space<vmem>>, vector<32x128xf32>
      %cst_17 = arith.constant dense<0xFF800000> : vector<32xf32>
      %20 = vector.multi_reduction <maximumf>, %19, %cst_17 [1] : vector<32x128xf32> to vector<32xf32>
      %21 = vector.shape_cast %20 : vector<32xf32> to vector<32x1xf32>
      %22 = arith.addf %18, %21 : vector<32x1xf32>
      %c0_18 = arith.constant 0 : index
      %c0_19 = arith.constant 0 : index
      %23 = vector.load %arg3[%c0_18, %c0_19] : memref<2x32xf32, #tpu.memory_space<vmem>>, vector<2x32xf32>
      %cst_20 = arith.constant dense<0.000000e+00> : vector<2x1xf32>
      %24 = tpu.matmul %23, %22, %cst_20 {dimension_numbers = #tpu.dot_dimension_numbers<[1], [0], [0], [1], [0, 0, 1, 1], [], []>} : vector<2x32xf32>, vector<32x1xf32>, vector<2x1xf32> -> vector<2x1xf32>
      %c0_21 = arith.constant 0 : index
      %c0_22 = arith.constant 0 : index
      %25 = vector.load %arg4[%c0_21, %c0_22] : memref<2x1xf32, #tpu.memory_space<vmem>>, vector<2x1xf32>
      %26 = arith.addf %24, %25 : vector<2x1xf32>
      %cst_23 = arith.constant 0.000000e+00 : f32
      %27 = vector.broadcast %cst_23 : f32 to vector<2x1xf32>
      %28 = arith.maximumf %26, %27 : vector<2x1xf32>
      %c0_24 = arith.constant 0 : index
      %c0_25 = arith.constant 0 : index
      %29 = vector.load %arg5[%c0_24, %c0_25] : memref<32x2xf32, #tpu.memory_space<vmem>>, vector<32x2xf32>
      %cst_26 = arith.constant dense<0.000000e+00> : vector<32x1xf32>
      %30 = tpu.matmul %29, %28, %cst_26 {dimension_numbers = #tpu.dot_dimension_numbers<[1], [0], [0], [1], [0, 0, 1, 1], [], []>} : vector<32x2xf32>, vector<2x1xf32>, vector<32x1xf32> -> vector<32x1xf32>
      %c0_27 = arith.constant 0 : index
      %c0_28 = arith.constant 0 : index
      %31 = vector.load %arg6[%c0_27, %c0_28] : memref<32x1xf32, #tpu.memory_space<vmem>>, vector<32x1xf32>
      %32 = arith.addf %30, %31 : vector<32x1xf32>
      %33 = arith.negf %32 : vector<32x1xf32>
      %34 = math.exp %33 : vector<32x1xf32>
      %cst_29 = arith.constant 1.000000e+00 : f32
      %35 = vector.broadcast %cst_29 : f32 to vector<32x1xf32>
      %36 = arith.addf %35, %34 : vector<32x1xf32>
      %37 = arith.divf %35, %36 : vector<32x1xf32>
      %c0_30 = arith.constant 0 : index
      %c0_31 = arith.constant 0 : index
      %c0_32 = arith.constant 0 : index
      %38 = vector.load %arg7[%c0_30, %c0_31, %c0_32] : memref<1x32x1xf32, #tpu.memory_space<vmem>>, vector<1x32x1xf32>
      %39 = vector.shape_cast %38 : vector<1x32x1xf32> to vector<32x1xf32>
      %40 = vector.shape_cast %37 : vector<32x1xf32> to vector<1x32x1xf32>
      tpu.vector_store %arg7[%c0_30, %c0_31, %c0_32], %40 {strides = array<i32>} : memref<1x32x1xf32, #tpu.memory_space<vmem>>, vector<1x32x1xf32>,
    } else {
    }
    return
  }
  func.func @transform_0(%arg0: i32, %arg1: i32) -> (i32, i32, i32) {
    %c0_i32 = arith.constant 0 : i32
    %c0_i32_0 = arith.constant 0 : i32
    return %arg0, %c0_i32, %arg1 : i32, i32, i32
  }
  func.func @transform_1(%arg0: i32, %arg1: i32) -> (i32, i32) {
    %c0_i32 = arith.constant 0 : i32
    %c0_i32_0 = arith.constant 0 : i32
    %c0_i32_1 = arith.constant 0 : i32
    return %c0_i32, %c0_i32_0 : i32, i32
  }
  func.func @transform_2(%arg0: i32, %arg1: i32) -> (i32, i32) {
    %c0_i32 = arith.constant 0 : i32
    %c0_i32_0 = arith.constant 0 : i32
    %c0_i32_1 = arith.constant 0 : i32
    return %c0_i32, %c0_i32_0 : i32, i32
  }
  func.func @transform_3(%arg0: i32, %arg1: i32) -> (i32, i32) {
    %c0_i32 = arith.constant 0 : i32
    %c0_i32_0 = arith.constant 0 : i32
    %c0_i32_1 = arith.constant 0 : i32
    return %c0_i32, %c0_i32_0 : i32, i32
  }
  func.func @transform_4(%arg0: i32, %arg1: i32) -> (i32, i32) {
    %c0_i32 = arith.constant 0 : i32
    %c0_i32_0 = arith.constant 0 : i32
    %c0_i32_1 = arith.constant 0 : i32
    return %c0_i32, %c0_i32_0 : i32, i32
  }
  func.func @transform_5(%arg0: i32, %arg1: i32) -> (i32, i32, i32) {
    %c0_i32 = arith.constant 0 : i32
    %c0_i32_0 = arith.constant 0 : i32
    %c0_i32_1 = arith.constant 0 : i32
    return %arg0, %c0_i32, %c0_i32_0 : i32, i32, i32
  }
}

</mosaic_0001>

<bundles_post_ra>
// kernel: tpu_custom_call.1
= control target key start
LH: loop header
LB: loop body
LE: loop exit
PB: predicated region body
PF: predicated region fallthrough
CT: control target
= control target key end

     0   :  { %10 = vsyncpa [#allocation5], 0  ;;  %s1114_s0 = inlined_call_operand.hbm [shape: f32[2,32,256], index: 0, kind: input, shape index: {}]   ;;  %s1115_s1 = inlined_call_operand.vmem [shape: f32[2,32], index: 1, kind: input, shape index: {}]   ;;  %s1116_s2 = inlined_call_operand.vmem [shape: f32[2,1], index: 2, kind: input, shape index: {}]   ;;  %s1117_s3 = inlined_call_operand.vmem [shape: f32[32,2], index: 3, kind: input, shape index: {}]   ;;  %s1118_s4 = inlined_call_operand.vmem [shape: f32[32,1], index: 4, kind: input, shape index: {}]   ;;  %s1119_s5 = inlined_call_operand.vmem [shape: f32[2,32,1], index: 5, kind: output, shape index: {}]  }
   0x1   :  { %12 = vsyncpa [#allocation5 + $0x1], 0  ;;  %s925_s18 = smov 0   ;;  %s927_s19 = smov 0  }
   0x2   :  { %s929_s20 = smov 0   ;;  %s931_s21 = smov 0  }
   0x3   :  { %s933_s22 = smov 0   ;;  %s935_s23 = smov 0  }
   0x4   :  { %s937_s24 = smov 0   ;;  %s939_s25 = smov 0  }
   0x5 LB: > { %s632_s26 = sadd.s32 4294967295, %s884_s25   ;;  %s27_s27 = sadd.s32 1, %s876_s23  ;;  %s884_s25 = sphi %s939_s25, %s18_s25   ;;  %s880_s24 = sphi %s937_s24, %s1133_s24   ;;  %s876_s23 = sphi %s935_s23, %s1132_s23   ;;  %s872_s22 = sphi %s933_s22, %s1131_s22   ;;  %s868_s21 = sphi %s931_s21, %s1130_s21   ;;  %s864_s20 = sphi %s929_s20, %s1129_s20   ;;  %s860_s19 = sphi %s927_s19, %s1128_s19   ;;  %s856_s18 = sphi %s925_s18, %s1127_s18  }
   0x6   : > { %p28_p0 = scmp.ge.s32.totalorder %s27_s27, 2  ;;  %s30_s28 = sadd.s32 1, %s880_s24 }
   0x7   : > { %s39_s29 = sadd.s32 1, %s864_s20  ;;  %p46_p1 = scmp.ne.s32.totalorder %s864_s20, %s860_s19 }
   0x8   : > { %s1135_s27 = smov (%p28_p0, %s27_s27), 0  ;;  %s1137_s28 = smov (!%p28_p0, %s30_s28), %s880_s24 }
   0x9   : > { %1121 = sst [smem:[#allocation7_spill]] %s1135_s27  ;;  %s35_s30 = ssub.s32 %s876_s23, %s1135_s27 }
   0xa   : > { %p47_p2 = scmp.eq.s32.totalorder %s884_s25, 0  ;;  %p32_p3 = scmp.ge.s32.totalorder %s1137_s28, 2 }
   0xb   : > { %p52_p4 = scmp.ne.s32.totalorder %s860_s19, %s856_s18  ;;  %p53_p6 = scmp.eq.s32.totalorder %s632_s26, 0 }
   0xc   : > { %p976_p5 = por %p47_p2, %p46_p1  ;;  %s1139_s28 = smov (%p32_p3, %s1137_s28), 0 }
   0xd   : > { %p982_p7 = por %p53_p6, %p52_p4  ;;  %s34_s8 = ssub.s32 %s880_s24, %s1139_s28 }
   0xe   : > { %p699_p8 = scmp.lt.s32.totalorder %s884_s25, 4  ;;  %s36_s9 = sor.u32 %s35_s30, %s34_s8 }
   0xf   : > { %s198_s10 = sand.u32 1, %s864_s20   ;;  %p37_p9 = scmp.eq.s32.totalorder %s36_s9, 0 }
  0x10   : > { %s636_s11 = sshll.u32 %s198_s10, 5  ;;  %s637_s12 = sshll.u32 %s880_s24, 3 }
  0x11   : > { %s992_s13 = scalar_select %p37_p9, %s864_s20, %s39_s29  }
  0x12   : > { %s207_s14 = sadd.s32 %s876_s23, %s637_s12  ;;  %s202_s16 = scalar_lea.vmem [#allocation4], %s636_s11 }
  0x13   : > { %s638_s15 = sshll.u32 %s207_s14, 7  ;;  %s210_s17 = sshll.u32 %s202_s16, 4  ;;  %s1000_s17 = int_to_ptr.vmem [resolvable:$true] %s210_s17 }
  0x14   : > { %s998_s27 = scalar_lea.hbm %s1114_s0, %s638_s15  ;;  %p1006_p10 = pnand %p699_p8, %p976_p5 }
  0x15   : > { %s1011_s30 = scalar_lea.sflag [#allocation5], %s198_s10  ;;  %s788_s8 = scalar_lea.hbm %s998_s27, 512 }
  0x16   : > { %p789_p12 = scmp.ne.s32.totalorder %s998_s27, %s788_s8  ;;  %p790_p13 = pneg %p1006_p10 }
  0x17   : > { %s793_s11 = scalar_lea.hbm %s1114_s0, 2048  ;;  %p794_p2 = scmp.lt.u32.totalorder %s998_s27, %s1114_s0 }
  0x18   : > { %p791_p0 = pnand %p790_p13, %p789_p12  ;;  %p795_p3 = scmp.lt.u32.totalorder %s793_s11, %s788_s8 }
  0x19   : > { %p797_p5 = scmp.lt.u32.totalorder %s788_s8, %s998_s27 }
  0x1a   : > { %p792_p1 = pneg %p791_p0  ;;  %p796_p4 = por %p795_p3, %p794_p2 }
  0x1c   : > { %p798_p6 = por %p797_p5, %p796_p4 }
  0x1e   : > { %p799_p8 = pnand %p798_p6, %p792_p1 }
  0x20   : > { %802 = shalt.err (!%p799_p8)
}
  0x21   : > { %s803_s10 = scalar_lea.vmem %s1000_s17, 512  ;;  %s886_s15 = smov [#allocation4]  }
  0x22   : > { %p804_p9 = scmp.ne.s32.totalorder %s1000_s17, %s803_s10  ;;  %s808_s16 = sshll.u32 %s886_s15, 4  ;;  %s809_s16 = int_to_ptr.vmem [resolvable:$false] %s808_s16 }
  0x23   : > { %s810_s18 = scalar_lea.vmem %s809_s16, 1024  ;;  %p811_p11 = scmp.lt.s32.totalorder %s1000_s17, %s809_s16 }
  0x24   : > { %p806_p12 = pnand %p804_p9, %p790_p13  ;;  %p812_p2 = scmp.lt.s32.totalorder %s810_s18, %s803_s10 }
  0x26   : > { %p807_p0 = pneg %p806_p12  ;;  %p813_p3 = por %p812_p2, %p811_p11 }
  0x28   : > { %p814_p4 = pnand %p813_p3, %p807_p0 }
  0x2a   : > { %817 = shalt.err (!%p814_p4)
}
  0x2b   : > { %s887_s26 = smov 256   ;;  %s888_s8 = smov 128  }
  0x2c   : > { %s889_s9 = smov 8   ;;  %p218_p13 = scmp.lt.s32.totalorder %s884_s25, 5 }
  0x2d   : > { %698 = dma.hbm_to_vmem [thread:$0]  (!%p1006_p10), %s998_s27, 512, %s1000_s17, %s1011_s30, %s887_s26, %s888_s8, %s889_s9  }
  0x2e   : > { %p1125_p1 = scmp.ge.s32.totalorder %s884_s25, 1 }
  0x30   : > { %p219_p5 = pnand %p1125_p1, %p218_p13 }
  0x31   : > { %s224_s6 = sand.u32 (!%p219_p5), 1, %s860_s19  }
  0x32   : > { %222 = sbr.rel (%p219_p5) target bundleno = 706 (0x2c2), region = 40  ;;  %s640_s11 = sshll.u32 (!%p219_p5), %s224_s6, 5 }
  0x33   : > { %s225_s12 = scalar_lea.sflag (!%p219_p5), [#allocation5], %s224_s6  ;;  %s228_s14 = scalar_lea.vmem (!%p219_p5), [#allocation4], %s640_s11 }
  0x39   : > { %851 = dma.done.wait (%p982_p7), %s225_s12, 512  }
  0x3a   : > { %853 = vsyncadd (%p982_p7), %s225_s12, 4294966784  ;;  %p255_p11 = scmp.lt.s32.totalorder %s872_s22, 1  ;;  %p643_p10 = scmp.ne.s32.totalorder %s868_s21, 0 }
  0x3b   : > { %v890_v0 = vmov (!%p643_p10), 0.0   ;;  %v891_v1 = vmov (!%p643_p10), -inf  }
  0x3c   : > { %s1141_s22 = smov (!%p255_p11, %s872_s22), 1  ;;  %263 = sbr.rel (%p643_p10) target bundleno = 67 (0x43), region = 48 }
  0x3d   : > { %s657_s27 = sshll.u32 %s1141_s22, 5  ;;  %264 = vst [vmem:[#allocation2] sm:$0xff] (!%p643_p10), %v890_v0  ;;  %265 = vst [vmem:[#allocation2 + $0x8] sm:$0xff] (!%p643_p10), %v890_v0 }
  0x3e   : > { %s1052_s30 = scalar_lea.vmem %s1119_s5, %s657_s27  ;;  %266 = vst [vmem:[#allocation2 + $0x10] sm:$0xff] (!%p643_p10), %v890_v0  ;;  %267 = vst [vmem:[#allocation2 + $0x18] sm:$0xff] (!%p643_p10), %v890_v0 }
  0x3f   : > { %268 = vst [vmem:[#allocation3] sm:$0xff] (!%p643_p10), %v891_v1  ;;  %269 = vst [vmem:[#allocation3 + $0x8] sm:$0xff] (!%p643_p10), %v891_v1 }
  0x40   : > { %270 = vst [vmem:[#allocation3 + $0x10] sm:$0xff] (!%p643_p10), %v891_v1  ;;  %271 = vst [vmem:[#allocation3 + $0x18] sm:$0xff] (!%p643_p10), %v891_v1 }
  0x43 PF: > { %v272_v2 = vld [vmem:[%s228_s14] sm:$0xff]  ;;  %v273_v4 = vld [vmem:[%s228_s14 + $0x8] sm:$0xff]  ;;  %v274_v7 = vld [vmem:[%s228_s14 + $0x10] sm:$0xff]  ;;  %p644_p7 = scmp.ne.s32.totalorder %s868_s21, 1 }
  0x44   : > { %v276_v3 = vld [vmem:[#allocation2] sm:$0xff]  ;;  %v277_v6 = vld [vmem:[#allocation2 + $0x8] sm:$0xff]  ;;  %v275_v11 = vld [vmem:[%s228_s14 + $0x18] sm:$0xff]  ;;  %v892_v30 = vmov (!%p644_p7), 0.0|0.0   ;;  %vm893_vm0 = vmmov (!%p644_p7), 0   ;;  %v894_v31 = vmov (!%p644_p7), 0.0  }
  0x45   : > { %v280_v5 = vadd.f32 %v276_v3, %v272_v2  ;;  %v278_v8 = vld [vmem:[#allocation2 + $0x10] sm:$0xff]  ;;  %v281_v9 = vadd.f32 %v277_v6, %v273_v4  ;;  %v279_v12 = vld [vmem:[#allocation2 + $0x18] sm:$0xff]  ;;  %303 = sbr.rel (%p644_p7) target bundleno = 706 (0x2c2), region = 52  ;;  %687 = vmatprep.subr.bf16.mxu0 (!%p644_p7), %v892_v30  ;;  %676 = vmatprep.mubr.msk.f32.mxu0 (!%p644_p7), %vm893_vm0, %v894_v31  ;;  %v336_v50 = vld [vmem:[%s1115_s1] sm:$0x3] (!%p644_p7)  ;;  %vm338_vm1 = vcmask (!%p644_p7), 261120  }
  0x46   : > { %v282_v10 = vadd.f32 %v278_v8, %v274_v7  ;;  %v288_v13 = vld [vmem:[#allocation3] sm:$0xff]  ;;  %v283_v14 = vadd.f32 %v279_v12, %v275_v11  ;;  %v289_v16 = vld [vmem:[#allocation3 + $0x8] sm:$0xff]  ;;  %vm421_vm2 = vcmask (!%p644_p7), 15360   ;;  %vm434_vm3 = vcmask (!%p644_p7), 1041408   ;;  %v415_v58 = vld [vmem:[%s1117_s3 + $0x10] sm:$0xff] (!%p644_p7) }
  0x47   : > { %284 = vst [vmem:[#allocation2] sm:$0xff] %v280_v5  ;;  %v292_v15 = vmax.f32 %v288_v13, %v272_v2  ;;  %v290_v17 = vld [vmem:[#allocation3 + $0x10] sm:$0xff]  ;;  %v291_v18 = vld [vmem:[#allocation3 + $0x18] sm:$0xff]  ;;  %285 = vst [vmem:[#allocation2 + $0x8] sm:$0xff] %v281_v9  ;;  %v293_v19 = vmax.f32 %v289_v16, %v273_v4  ;;  %vm547_vm4 = vcmask (!%p644_p7), 7168  }
  0x48   : > { %286 = vst [vmem:[#allocation2 + $0x10] sm:$0xff] %v282_v10  ;;  %v294_v20 = vmax.f32 %v290_v17, %v274_v7  ;;  %v295_v21 = vmax.f32 %v291_v18, %v275_v11  ;;  %287 = vst [vmem:[#allocation2 + $0x18] sm:$0xff] %v283_v14  ;;  %v413_v51 = vld [vmem:[%s1117_s3] sm:$0xff] (!%p644_p7)  ;;  %v414_v57 = vld [vmem:[%s1117_s3 + $0x8] sm:$0xff] (!%p644_p7) }
  0x49   : > { %296 = vst [vmem:[#allocation3] sm:$0xff] %v292_v15  ;;  %297 = vst [vmem:[#allocation3 + $0x8] sm:$0xff] %v293_v19  ;;  %681 = vmatprep.mubr.msk.f32.mxu1 (!%p644_p7), %vm421_vm2, %v413_v51  ;;  %v337_v52 = vld [vmem:[%s1116_s2] sm:$0x3] (!%p644_p7)  ;;  %v416_v59 = vld [vmem:[%s1117_s3 + $0x18] sm:$0xff] (!%p644_p7) }
  0x4a   : > { %298 = vst [vmem:[#allocation3 + $0x10] sm:$0xff] %v294_v20  ;;  %299 = vst [vmem:[#allocation3 + $0x18] sm:$0xff] %v295_v21  ;;  %v418_v60 = vld [vmem:[%s1118_s4 + $0x8] sm:$0xff] (!%p644_p7)  ;;  %v417_v61 = vld [vmem:[%s1118_s4] sm:$0xff] (!%p644_p7) }
  0x4b   : > { %v420_v2 = vld [vmem:[%s1118_s4 + $0x18] sm:$0xff] (!%p644_p7)  ;;  %v419_v4 = vld [vmem:[%s1118_s4 + $0x10] sm:$0xff] (!%p644_p7) }
  0x4e   : > { %v304_v23 = vld [vmem:[#allocation2] sm:$0xff]  ;;  %v305_v25 = vld [vmem:[#allocation2 + $0x8] sm:$0xff] }
  0x4f   : > { %308 = vadd.xlane.f32.xlu0 %v304_v23  ;;  %v307_v26 = vld [vmem:[#allocation2 + $0x18] sm:$0xff]  ;;  %v306_v27 = vld [vmem:[#allocation2 + $0x10] sm:$0xff] }
  0x50   : > { %v320_v22 = vld [vmem:[#allocation3] sm:$0xff]  ;;  %v321_v24 = vld [vmem:[#allocation3 + $0x8] sm:$0xff] }
  0x51   : > { %324 = vmax.xlane.f32.xlu1 %v320_v22  ;;  %v323_v28 = vld [vmem:[#allocation3 + $0x18] sm:$0xff]  ;;  %v322_v29 = vld [vmem:[#allocation3 + $0x10] sm:$0xff] }
  0x53   : > { %310 = vadd.xlane.f32.xlu0 %v305_v25 }
  0x55   : > { %326 = vmax.xlane.f32.xlu1 %v321_v24 }
  0x57   : > { %312 = vadd.xlane.f32.xlu0 %v306_v27 }
  0x59   : > { %314 = vadd.xlane.f32.xlu1 %v307_v26 }
  0x5b   : > { %328 = vmax.xlane.f32.xlu0 %v322_v29 }
  0x5d   : > { %330 = vmax.xlane.f32.xlu1 %v323_v28 }
  0xdc   : > { %v309_v33 = vpop.xlane.xlu0 %308 }
  0xdd   : > { %v316_v34 = vmul.f32 0.00390625, %v309_v33 }
  0xde   : > { %v325_v32 = vpop.xlane.xlu1 %324 }
  0xdf   : > { %v332_v38 = vadd.f32 %v325_v32, %v316_v34 }
  0xe0   : > { %v311_v36 = vpop.xlane.xlu0 %310 }
  0xe1   : > { %v317_v37 = vmul.f32 0.00390625, %v311_v36 }
  0xe2   : > { %v327_v35 = vpop.xlane.xlu1 %326 }
  0xe3   : > { %v333_v39 = vadd.f32 %v327_v35, %v317_v37 }
  0xe4   : > { %v313_v41 = vpop.xlane.xlu0 %312 }
  0xe5   : > { %v688_v42 = vpack.c.bf16 %v333_v39, %v332_v38  ;;  %v318_v44 = vmul.f32 0.00390625, %v313_v41 }
  0xe6   : > { %v315_v40 = vpop.xlane.xlu1 %314 }
  0xe7   : > { %v319_v43 = vmul.f32 0.00390625, %v315_v40  ;;  %689 = vmatpush3.bf16.msra.mxu0 %v688_v42 }
  0xe8   : > { %v329_v46 = vpop.xlane.xlu0 %328  ;;  %690 = vmatprep.subr.bf16.mxu0 %v892_v30 }
  0xe9   : > { %v334_v48 = vadd.f32 %v329_v46, %v318_v44 }
  0xea   : > { %v331_v45 = vpop.xlane.xlu1 %330 }
  0xeb   : > { %v335_v47 = vadd.f32 %v331_v45, %v319_v43 }
  0xed   : > { %v691_v49 = vpack.c.bf16 %v335_v47, %v334_v48 }
  0xef   : > { %692 = vmatpush3.bf16.msra.mxu0 %v691_v49 }
  0xf2   : > { %677 = vmatmul.mubr.msk.f32.vlgmr.msra.gmra.mrb[0].mxu0 %vm338_vm1, %v336_v50 }
 0x1c5   : > { %v408_v53 = vpop.f32.mrb[0].mxu0 }
 0x1c6   : > { %v409_v54 = vadd.f32 %v408_v53, %v337_v52  ;;  %v678_v55 = vpop.f32.mrb[1].mxu0 }
 0x1c8   : > { %v412_v56 = vmax.f32 %v409_v54, 0.0 }
 0x1ca   : > { %679 = vmatprep.subr.msk.mxu1 %vm434_vm3, %v412_v56 }
 0x1cb   : > { %680 = vmatpush3.msk.msra.mxu1 %vm434_vm3, %v412_v56 }
 0x1cc   : > { %682 = vmatmul.mubr.msk.f32.vlgmr.msra.gmra.mrb[0].mxu1 %vm421_vm2, %v414_v57 }
 0x1cd   : > { %684 = vmatprep.mubr.msk.f32.mxu1 %vm421_vm2, %v415_v58 }
 0x1d0   : > { %685 = vmatmul.mubr.msk.f32.gmra.mrb[2].mxu1 %vm421_vm2, %v416_v59 }
 0x29f   : > { %v683_v62 = vpop.f32.mrb[0].mxu1 }
 0x2a0   : > { %v510_v63 = vadd.f32 %v683_v62, %v418_v60  ;;  %v504_v0 = vpop.f32.mrb[1].mxu1 }
 0x2a1   : > { %v505_v1 = vadd.f32 %v504_v0, %v417_v61 }
 0x2a2   : > { %v652_v3 = vmul.f32 -1.442695, %v510_v63 }
 0x2a3   : > { %v651_v5 = vmul.f32 -1.442695, %v505_v1  ;;  %v686_v6 = vpop.f32.mrb[2].mxu1 }
 0x2a4   : > { %772 = vpow2.f32 %v652_v3  ;;  %v520_v7 = vadd.f32 %v686_v6, %v420_v2  ;;  %v514_v8 = vpop.f32.mrb[3].mxu1 }
 0x2a5   : > { %774 = vpow2.f32 %v651_v5  ;;  %v515_v9 = vadd.f32 %v514_v8, %v419_v4 }
 0x2a6   : > { %v654_v10 = vmul.f32 -1.442695, %v520_v7 }
 0x2a7   : > { %v653_v11 = vmul.f32 -1.442695, %v515_v9 }
 0x2a8   : > { %776 = vpow2.f32 %v654_v10 }
 0x2a9   : > { %778 = vpow2.f32 %v653_v11 }
 0x2ae   : > { %v773_v12 = vpop.eup %772 }
 0x2af   : > { %v775_v13 = vpop.eup %774  ;;  %v536_v14 = vadd.f32 1.0, %v773_v12 }
 0x2b0   : > { %v535_v15 = vadd.f32 1.0, %v775_v13 }
 0x2b1   : > { %780 = vrcp.f32 %v536_v14 }
 0x2b2   : > { %v777_v16 = vpop.eup %776  ;;  %782 = vrcp.f32 %v535_v15 }
 0x2b3   : > { %v779_v17 = vpop.eup %778  ;;  %v538_v18 = vadd.f32 1.0, %v777_v16 }
 0x2b4   : > { %v537_v19 = vadd.f32 1.0, %v779_v17 }
 0x2b5   : > { %784 = vrcp.f32 %v538_v18 }
 0x2b6   : > { %786 = vrcp.f32 %v537_v19 }
 0x2bb   : > { %v781_v20 = vpop.eup %780 }
 0x2bc   : > { %v783_v21 = vpop.eup %782  ;;  %549 = vst.msk [vmem:[%s1052_s30 + $0x8] sm:$0xff] %vm547_vm4, %v781_v20 }
 0x2bd   : > { %548 = vst.msk [vmem:[%s1052_s30] sm:$0xff] %vm547_vm4, %v783_v21 }
 0x2bf   : > { %v785_v22 = vpop.eup %784 }
 0x2c0   : > { %v787_v23 = vpop.eup %786  ;;  %551 = vst.msk [vmem:[%s1052_s30 + $0x18] sm:$0xff] %vm547_vm4, %v785_v22 }
 0x2c1   : > { %550 = vst.msk [vmem:[%s1052_s30 + $0x10] sm:$0xff] %vm547_vm4, %v787_v23 }
 0x2c2 PF: > { %s18_s25 = sadd.s32 1, %s884_s25   ;;  %s1126_s10 = sld [smem:[#allocation7_spill]] }
 0x2c3   : > { %p15_p6 = scmp.ge.s32.totalorder %s18_s25, 6   ;;  %s1127_s18 = smov %s860_s19 }
 0x2c4   : > { %s1128_s19 = smov %s864_s20  ;;  %s1129_s20 = smov %s992_s13 }
 0x2c5   : > { %s1130_s21 = smov %s876_s23  ;;  %s1131_s22 = smov %s880_s24 }
 0x2c6   : > { %s1133_s24 = smov %s1139_s28  ;;  %17 = sbr.rel (!%p15_p6) target bundleno = 5 (0x5), region = 88 }
 0x2c8   : > { %s1132_s23 = smov %s1126_s10 }
 0x2cd   :  { %573 = vsyncpa [#allocation5], 1 }
 0x2ce   :  { %575 = vsyncpa [#allocation5 + $0x1], 1 }

</bundles_post_ra>
